<compile_context>
chip_gen: v7x
topology: tpu7x:2x2x1
jax: 0.10.0
libtpu: 0.0.40
codegen_flags: <defaults>
</compile_context>

<pallas_src>
import functools

import jax
import jax.numpy as jnp
from jax.experimental import pallas as pl
from jax.experimental.pallas import tpu as pltpu


def _vmem_capacity_bytes() -> int:
    """Physical per-core VMEM; conservative fallback if the query fails."""
    try:
        return int(pltpu.get_tpu_info().vmem_capacity_bytes)
    except Exception:
        return 64 * 1024 * 1024  # v7x per-TensorCore size (smallest generation)


def _attention_kernel(x_ref, w_ref, o_ref):
    # x_ref: (Bt, T, D)   w_ref: (1, D)   o_ref: (Bt, D)
    x = x_ref[...]
    w = w_ref[...]

    # Attention scores, lane-dense (Bt, T): VPU multiply in the input dtype,
    # lane (XLU) reduce accumulating in f32 — no f32 copy of the whole slab.
    scores = jnp.sum(x * w[None, :, :], axis=-1, dtype=jnp.float32)   # (Bt, T)

    # Numerically-stable, EXACT softmax over the time axis (matches torch).
    m = jnp.max(scores, axis=-1, keepdims=True)                       # (Bt, 1)
    e = jnp.exp(scores - m)                                           # (Bt, T)
    attn = e / jnp.sum(e, axis=-1, keepdims=True)                     # (Bt, T)

    # Weighted time-pool on the VPU: per-term products in x.dtype, reduction
    # over T (sublane axis) accumulates in f32.  Avoids the M=1 MXU matvec.
    ctx = jnp.sum(x * attn[:, :, None].astype(x.dtype), axis=1,
                  dtype=jnp.float32)                                  # (Bt, D)
    o_ref[...] = ctx.astype(o_ref.dtype)


def _choose_block_b(B, T, D, itemsize):
    """Pick the batch-block size (multiple of 8 when possible, divides B)."""
    vmem_cap = _vmem_capacity_bytes()
    # Target total resident footprint (2x double-buffered input slab + f32
    # temps + output) well inside physical VMEM on every generation:
    # ~45 MiB on v7x (64 MiB VMEM), capped at 96 MiB on v5e/v6e (128 MiB VMEM).
    total_budget = min(int(0.70 * vmem_cap), 96 * 1024 * 1024)
    slab_budget = total_budget // 3            # one of the two input buffers
    max_bt = max(1, slab_budget // (T * D * itemsize))
    if max_bt >= 8:
        max_bt = (max_bt // 8) * 8

    if B <= max_bt:
        # Whole batch fits in one block.  Split into 2 balanced blocks when the
        # batch is big enough so the second TensorCore (v7x) has work.
        if B >= 16 and (B // 2) % 8 == 0:
            return B // 2
        return B

    # Prefer a multiple-of-8 block size that divides B (no padding copy).
    start = (min(max_bt, B) // 8) * 8
    for bt in range(start, 0, -8):
        if B % bt == 0:
            return bt
    return max_bt


@functools.partial(jax.jit, static_argnums=(2,))
def _attention_forward_impl(lstm_out, w_row, bt):
    B, T, D = lstm_out.shape
    n_blocks = pl.cdiv(B, bt)
    Bp = n_blocks * bt

    x = lstm_out
    if Bp != B:
        # Rare fallback (no multiple-of-8 bt divides B): zero rows give a
        # uniform softmax and a zero context; sliced off below.
        x = jnp.pad(lstm_out, ((0, Bp - B), (0, 0), (0, 0)))

    vmem_limit = min(int(0.80 * _vmem_capacity_bytes()), 100 * 1024 * 1024)

    out = pl.pallas_call(
        _attention_kernel,
        out_shape=jax.ShapeDtypeStruct((Bp, D), lstm_out.dtype),
        grid_spec=pltpu.PrefetchScalarGridSpec(
            num_scalar_prefetch=0,
            grid=(n_blocks,),
            in_specs=[
                pl.BlockSpec((bt, T, D), lambda b: (b, 0, 0)),
                pl.BlockSpec((1, D), lambda b: (0, 0)),
            ],
            out_specs=pl.BlockSpec((bt, D), lambda b: (b, 0)),
        ),
        compiler_params=pltpu.CompilerParams(
            dimension_semantics=("parallel",),
            vmem_limit_bytes=vmem_limit,
        ),
    )(x, w_row)

    return out[:B] if Bp != B else out


def attention_forward(lstm_out: jax.Array, attention_weights: jax.Array,
                      *, block_b=None) -> jax.Array:
    """lstm_out: (B, T, D) with D = 2*hidden_size; attention_weights: (D, 1)."""
    B, T, D = lstm_out.shape
    assert attention_weights.shape == (D, 1)

    itemsize = jnp.dtype(lstm_out.dtype).itemsize
    bt = block_b if block_b is not None else _choose_block_b(B, T, D, itemsize)
    w_row = attention_weights.reshape(1, D)   # lane-dense weight row
    return _attention_forward_impl(lstm_out, w_row, int(bt))


def _reference(lstm_out, w):
    scores = jnp.einsum("btd,dk->bt", lstm_out, w)
    attn = jax.nn.softmax(scores, axis=1)
    return jnp.sum(lstm_out * attn[..., None], axis=1)


if __name__ == "__main__":
    key = jax.random.PRNGKey(0)
    k_x, k_w = jax.random.split(key)

    batch, seq, hidden = 2, 8, 32
    D = hidden * 2  # bidirectional LSTM output width

    # deterministic xavier_uniform init for attention_weights of shape (2H, 1)
    fan_in, fan_out = D, 1
    bound = (6.0 / (fan_in + fan_out)) ** 0.5
    attention_weights = jax.random.uniform(
        k_w, (D, 1), minval=-bound, maxval=bound, dtype=jnp.float32
    )

    lstm_out = jax.random.normal(k_x, (batch, seq, D), dtype=jnp.float32)

    out = attention_forward(lstm_out, attention_weights)
    out = jax.block_until_ready(out)

    ref = _reference(lstm_out, attention_weights)
    assert out.shape == (batch, D)
    assert jnp.allclose(out, ref, atol=1e-4, rtol=1e-4), float(
        jnp.max(jnp.abs(out - ref))
    )

    print("KERNEL_OK")
</pallas_src>

<mosaic_0001>
module attributes {stable_mosaic.version = 11 : i64} {
  func.func @_attention_kernel(%arg0: i32, %arg1: memref<2x8x64xf32, #tpu.memory_space<vmem>>, %arg2: memref<1x64xf32, #tpu.memory_space<vmem>>, %arg3: memref<2x64xf32, #tpu.memory_space<vmem>>) attributes {dimension_semantics = [#tpu.dimension_semantics<parallel>], iteration_bounds = array<i64: 1>, scalar_prefetch = 0 : i64, scratch_operands = 0 : i64, tpu.core_type = #tpu.core_type<tc>, window_params = [{transform_indices = @transform_0, window_bounds = array<i64: 2, 8, 64>}, {pipeline_mode = #tpu.pipeline_mode<synchronous>, transform_indices = @transform_1, window_bounds = array<i64: 1, 64>}, {transform_indices = @transform_2, window_bounds = array<i64: 2, 64>}]} {
    %c0 = arith.constant 0 : index
    %c0_0 = arith.constant 0 : index
    %c0_1 = arith.constant 0 : index
    %0 = vector.load %arg1[%c0, %c0_0, %c0_1] : memref<2x8x64xf32, #tpu.memory_space<vmem>>, vector<2x8x64xf32>
    %c0_2 = arith.constant 0 : index
    %c0_3 = arith.constant 0 : index
    %1 = vector.load %arg2[%c0_2, %c0_3] : memref<1x64xf32, #tpu.memory_space<vmem>>, vector<1x64xf32>
    %2 = vector.shape_cast %1 : vector<1x64xf32> to vector<1x1x64xf32>
    %3 = vector.broadcast %2 : vector<1x1x64xf32> to vector<2x8x64xf32>
    %4 = arith.mulf %0, %3 : vector<2x8x64xf32>
    %cst = arith.constant dense<0.000000e+00> : vector<2x8xf32>
    %5 = vector.multi_reduction <add>, %4, %cst [2] : vector<2x8x64xf32> to vector<2x8xf32>
    %cst_4 = arith.constant dense<0xFF800000> : vector<2xf32>
    %6 = vector.multi_reduction <maximumf>, %5, %cst_4 [1] : vector<2x8xf32> to vector<2xf32>
    %7 = vector.shape_cast %6 : vector<2xf32> to vector<2x1xf32>
    %8 = vector.broadcast %7 : vector<2x1xf32> to vector<2x8xf32>
    %9 = arith.subf %5, %8 : vector<2x8xf32>
    %10 = math.exp %9 : vector<2x8xf32>
    %cst_5 = arith.constant dense<0.000000e+00> : vector<2xf32>
    %11 = vector.multi_reduction <add>, %10, %cst_5 [1] : vector<2x8xf32> to vector<2xf32>
    %12 = vector.shape_cast %11 : vector<2xf32> to vector<2x1xf32>
    %13 = vector.broadcast %12 : vector<2x1xf32> to vector<2x8xf32>
    %14 = arith.divf %10, %13 : vector<2x8xf32>
    %15 = vector.shape_cast %14 : vector<2x8xf32> to vector<2x8x1xf32>
    %16 = vector.broadcast %15 : vector<2x8x1xf32> to vector<2x8x64xf32>
    %17 = arith.mulf %0, %16 : vector<2x8x64xf32>
    %cst_6 = arith.constant dense<0.000000e+00> : vector<2x64xf32>
    %18 = vector.multi_reduction <add>, %17, %cst_6 [1] : vector<2x8x64xf32> to vector<2x64xf32>
    %c0_7 = arith.constant 0 : index
    %c0_8 = arith.constant 0 : index
    %19 = vector.load %arg3[%c0_7, %c0_8] : memref<2x64xf32, #tpu.memory_space<vmem>>, vector<2x64xf32>
    tpu.vector_store %arg3[%c0_7, %c0_8], %18 {strides = array<i32>} : memref<2x64xf32, #tpu.memory_space<vmem>>, vector<2x64xf32>,
    return
  }
  func.func @transform_0(%arg0: i32) -> (i32, i32, i32) {
    %c0_i32 = arith.constant 0 : i32
    %c0_i32_0 = arith.constant 0 : i32
    %c0_i32_1 = arith.constant 0 : i32
    return %arg0, %c0_i32, %c0_i32_0 : i32, i32, i32
  }
  func.func @transform_1(%arg0: i32) -> (i32, i32) {
    %c0_i32 = arith.constant 0 : i32
    %c0_i32_0 = arith.constant 0 : i32
    %c0_i32_1 = arith.constant 0 : i32
    return %c0_i32, %c0_i32_0 : i32, i32
  }
  func.func @transform_2(%arg0: i32) -> (i32, i32) {
    %c0_i32 = arith.constant 0 : i32
    %c0_i32_0 = arith.constant 0 : i32
    return %arg0, %c0_i32 : i32, i32
  }
}

</mosaic_0001>

<bundles_post_ra>
// kernel: _attention_forward_impl.1
= control target key start
LH: loop header
LB: loop body
LE: loop exit
PB: predicated region body
PF: predicated region fallthrough
CT: control target
= control target key end

     0   :  { %7 = vsyncpa [#allocation3], 0  ;;  %s283_s0 = inlined_call_operand.hbm [shape: f32[2,8,64], index: 0, kind: input, shape index: {}]   ;;  %s284_s1 = inlined_call_operand.vmem [shape: f32[1,64], index: 1, kind: input, shape index: {}]   ;;  %s285_s2 = inlined_call_operand.hbm [shape: f32[2,64], index: 2, kind: output, shape index: {}]  }
   0x1   :  { %8 = vsyncpa [#allocation4], 0  ;;  %s227_s9 = smov [#allocation2]   ;;  %s179_s13 = scalar_lea.hbm %s283_s0, 256 }
   0x2   :  { %s14_s10 = sshll.u32 %s227_s9, 4  ;;  %p180_p0 = scmp.ne.s32.totalorder %s283_s0, %s179_s13  ;;  %s15_s10 = int_to_ptr.vmem [resolvable:$true] %s14_s10 }
   0x3   :  { %p183_p1 = scmp.lt.u32.totalorder %s179_s13, %s283_s0 }
   0x5   :  { %p185_p2 = pnand %p183_p1, %p180_p0 }
   0x7   :  { %188 = shalt.err (!%p185_p2)
}
   0x8   :  { %s189_s18 = scalar_lea.vmem %s15_s10, 256  ;;  %p194_p4 = scmp.lt.s32.totalorder %s15_s10, %s15_s10 }
   0x9   :  { %p190_p3 = scmp.ne.s32.totalorder %s15_s10, %s189_s18  ;;  %p195_p5 = scmp.lt.s32.totalorder %s189_s18, %s189_s18 }
   0xb   :  { %p196_p6 = por %p195_p5, %p194_p4 }
   0xd   :  { %p197_p7 = pnand %p196_p6, %p190_p3 }
   0xf   :  { %200 = shalt.err (!%p197_p7)
}
  0x10   :  { %s228_s19 = smov 128   ;;  %s229_s20 = smov 8  }
  0x11   :  { %20 = dma.hbm_to_vmem [thread:$0]  %s283_s0, 256, %s15_s10, [#allocation3], %s228_s19, %s228_s19, %s229_s20  }
  0x12   :  { %223 = dma.done.wait [#allocation3], 256  }
  0x13   :  { %224 = vsyncadd [#allocation3], 4294967040  ;;  %v26_v0 = vld [vmem:[#allocation2] sm:$0xff]  ;;  %vm37_vm0 = vcmask 523264   ;;  %v27_v2 = vld [vmem:[#allocation2 + $0x8] sm:$0xff]  ;;  %v46_v7 = vlaneseq  ;;  %vm56_vm1 = vcmask 1041409  }
  0x14   :  { %v163_v1 = vld [vmem:[%s284_s1] ss:$0 sm:$0xff]  ;;  %vm59_vm2 = vcmask 58368   ;;  %v230_v17 = vmov 0   ;;  %s231_s0 = smov [#allocation5]   ;;  %vm146_vm3 = vcmask 517120  }
  0x15   :  { %v35_v3 = vmul.f32 %v163_v1, %v26_v0  ;;  %v36_v4 = vmul.f32 %v163_v1, %v27_v2  ;;  %v47_v8 = vand.u32 127, %v46_v7  ;;  %v49_v9 = vshrl.u32 %v46_v7, 7  ;;  %170 = vset.pattern.permute.xlu0 %v230_v17  ;;  %169 = vset.pattern.permute.xlu1 %v230_v17  ;;  %s154_s1 = sshll.u32 %s231_s0, 4  ;;  %s155_s1 = int_to_ptr.vmem [resolvable:$true] %s154_s1 }
  0x16   :  { %s201_s25 = scalar_lea.vmem %s155_s1, 32  ;;  %p206_p9 = scmp.lt.s32.totalorder %s155_s1, %s155_s1 }
  0x17   :  { %v38_v5 = vsel %vm37_vm0, %v35_v3, 0.0  ;;  %v41_v6 = vsel %vm37_vm0, %v36_v4, 0.0  ;;  %v50_v11 = vsub.s32 %v47_v8, %v49_v9  ;;  %v66_v18 = vsub.s32 0, %v49_v9  ;;  %p202_p8 = scmp.ne.s32.totalorder %s155_s1, %s201_s25  ;;  %p207_p10 = scmp.lt.s32.totalorder %s201_s25, %s201_s25 }
  0x18   :  { %39 = vadd.xlane.f32.xlu0 %v38_v5  ;;  %v70_v19 = vsub.s32 1, %v49_v9 }
  0x19   :  { %p208_p11 = por %p207_p10, %p206_p9 }
  0x1b   :  { %p209_p12 = pnand %p208_p11, %p202_p8 }
  0x1c   :  { %42 = vadd.xlane.f32.xlu0 %v41_v6 }
  0xa5   :  { %v40_v10 = vpop.xlane.xlu0 %39 }
  0xa6   :  { %v51_v13 = vrot.slane %v40_v10, %v50_v11 }
  0xa9   :  { %v43_v12 = vpop.xlane.xlu0 %42 }
  0xaa   :  { %v55_v14 = vrot.slane %v43_v12, %v50_v11 }
  0xac   :  { %v57_v15 = vsel %vm56_vm1, %v55_v14, %v51_v13 }
  0xad   :  { %v60_v16 = vsel %vm59_vm2, %v57_v15, -inf }
  0xae   :  { %61 = vmax.xlane.f32.xlu1 %v60_v16 }
 0x13b   :  { %v62_v20 = vpop.xlane.xlu1 %61 }
 0x13c   :  { %v67_v21 = vrot.slane %v62_v20, %v66_v18  ;;  %v71_v22 = vrot.slane %v62_v20, %v70_v19 }
 0x13e   :  { %v74_v23 = vsub.f32 %v40_v10, %v67_v21  ;;  %v75_v24 = vsub.f32 %v43_v12, %v71_v22 }
 0x140   :  { %v76_v25 = vmul.f32 1.442695, %v74_v23  ;;  %v78_v26 = vmul.f32 1.442695, %v75_v24 }
 0x142   :  { %171 = vpow2.f32 %v76_v25 }
 0x143   :  { %173 = vpow2.f32 %v78_v26 }
 0x14c   :  { %v172_v27 = vpop.eup %171 }
 0x14d   :  { %v174_v28 = vpop.eup %173  ;;  %83 = vperm.xlu1 %169, %v172_v27  }
 0x14e   :  { %86 = vperm.xlu0 %170, %v174_v28  }
 0x1cc   :  { %v84_v29 = vpop.permute.xlu1 %83 }
 0x1cd   :  { %v87_v30 = vpop.permute.xlu0 %86  ;;  %v91_v31 = vrot.slane %v84_v29, %v50_v11 }
 0x1ce   :  { %v95_v32 = vrot.slane %v87_v30, %v50_v11 }
 0x1d0   :  { %v96_v33 = vsel %vm56_vm1, %v95_v32, %v91_v31 }
 0x1d1   :  { %v98_v34 = vsel %vm59_vm2, %v96_v33, 0.0 }
 0x1d2   :  { %99 = vadd.xlane.f32.xlu1 %v98_v34 }
 0x25f   :  { %v100_v35 = vpop.xlane.xlu1 %99 }
 0x260   :  { %v105_v36 = vrot.slane %v100_v35, %v66_v18  ;;  %v109_v37 = vrot.slane %v100_v35, %v70_v19 }
 0x262   :  { %175 = vrcp.f32 %v105_v36 }
 0x263   :  { %177 = vrcp.f32 %v109_v37 }
 0x26c   :  { %v176_v38 = vpop.eup %175 }
 0x26d   :  { %v113_v39 = vmul.f32 %v176_v38, %v172_v27  ;;  %v178_v40 = vpop.eup %177 }
 0x26e   :  { %v115_v41 = vmul.f32 %v178_v40, %v174_v28 }
 0x26f   :  { %118 = vperm.xlu0 %170, %v113_v39  }
 0x273   :  { %123 = vperm.xlu0 %170, %v115_v41  }
 0x2ee   :  { %v119_v42 = vpop.permute.xlu0 %118 }
 0x2ef   :  { %v126_v43 = vmul.f32 %v119_v42, %v26_v0 }
 0x2f1   :  { %v128_v44 = vsel %vm37_vm0, %v126_v43, 0.0 }
 0x2f2   :  { %v129_v45 = vrot.slane %v128_v44, 4  ;;  %v124_v46 = vpop.permute.xlu0 %123 }
 0x2f3   :  { %v127_v47 = vmul.f32 %v124_v46, %v27_v2 }
 0x2f4   :  { %v130_v48 = vadd.f32 %v129_v45, %v128_v44 }
 0x2f5   :  { %v135_v49 = vsel %vm37_vm0, %v127_v47, 0.0 }
 0x2f6   :  { %v131_v50 = vrot.slane %v130_v48, 2  ;;  %v136_v51 = vrot.slane %v135_v49, 4 }
 0x2f8   :  { %v132_v52 = vadd.f32 %v131_v50, %v130_v48  ;;  %v137_v53 = vadd.f32 %v136_v51, %v135_v49 }
 0x2fa   :  { %v138_v54 = vrot.slane %v137_v53, 2  ;;  %v133_v55 = vrot.slane %v132_v52, 1 }
 0x2fc   :  { %v139_v56 = vadd.f32 %v138_v54, %v137_v53  ;;  %v134_v58 = vadd.f32 %v133_v55, %v132_v52 }
 0x2fe   :  { %v140_v57 = vrot.slane %v139_v56, 1 }
 0x300   :  { %v141_v59 = vadd.f32 %v140_v57, %v139_v56 }
 0x302   :  { %v144_v60 = vsel %vm56_vm1, %v141_v59, %v134_v58 }
 0x303   :  { %147 = vst.msk [vmem:[#allocation5] sm:$0x3] %vm146_vm3, %v144_v60 }
 0x304   :  { %212 = shalt.err (!%p209_p12)
}
 0x305   :  { %s213_s28 = scalar_lea.hbm %s285_s2, 32 }
 0x306   :  { %p214_p13 = scmp.ne.s32.totalorder %s285_s2, %s213_s28  ;;  %p217_p0 = scmp.lt.u32.totalorder %s213_s28, %s285_s2 }
 0x308   :  { %p219_p1 = pnand %p217_p0, %p214_p13 }
 0x30a   :  { %222 = shalt.err (!%p219_p1)
}
 0x30b   :  { %157 = dma.vmem_to_hbm [thread:$0]  %s155_s1, 32, %s285_s2, [#allocation4]  }
 0x30c   :  { %225 = dma.done.wait [#allocation4], 32  }
 0x30d   :  { %226 = vsyncadd [#allocation4], 4294967264 }
 0x30e   :  { %161 = vsyncpa [#allocation3], 1 }
 0x30f   :  { %162 = vsyncpa [#allocation4], 1 }

</bundles_post_ra>
